<compile_context>
chip_gen: v7x
topology: tpu7x:2x2x1
jax: 0.10.0
libtpu: 0.0.40
codegen_flags: <defaults>
</compile_context>

<pallas_src>
import numpy as np
import jax
import jax.numpy as jnp
from jax.experimental import pallas as pl
from jax.experimental.pallas import tpu as pltpu

# ----------------------- synthetic config (stands in for get_cfg_defaults) -----------------------
CHANNEL_DICT    = {'x1': 8, 'x2': 16}          # backbone channels per pyramid layer
SPATIAL         = {'x1': (16, 16), 'x2': (8, 8)}
LAYERS          = sorted(CHANNEL_DICT.keys())  # cfg.MODEL.BACKBONE.LAYERS (sorted, no 'x_label')
FIRST_CONV_SIZE = 8
SPP_LEVELS      = [1, 2, 4]                    # -> BINS = 1 + 4 + 16 = 21
FC_HIDDEN_DIM   = 32
OUTPUT_SIZE     = 10                           # stands in for len(torch.load(ROI voxel index))
POOLING_MODE    = 'avg'                        # fold below is only valid for average pooling
PLANES          = {k: min(v, FIRST_CONV_SIZE) for k, v in CHANNEL_DICT.items()}
BINS            = sum(i * i for i in SPP_LEVELS)
OUT_PAD         = ((OUTPUT_SIZE + 127) // 128) * 128        # lane-dense padded output width
BATCH_TILE      = 256                          # batch tile for large N (multiple of 16 for bf16)


# --------------------------------------- helpers (glue) ------------------------------------------
def make_pool_matrix(H, W, levels):
    """(BINS, H*W) averaging matrix; equals adaptive_avg_pool2d when H % i == 0, W % i == 0."""
    rows = []
    for i in levels:
        assert H % i == 0 and W % i == 0  # TODO(synk): general adaptive bins for non-divisible sizes
        bh, bw = H // i, W // i
        for a in range(i):
            for b in range(i):
                m = np.zeros((H, W), dtype=np.float64)
                m[a * bh:(a + 1) * bh, b * bw:(b + 1) * bw] = 1.0 / (bh * bw)
                rows.append(m.reshape(-1))
    return np.stack(rows, axis=0)


def permute_fc1_weight(w_torch_order, P, levels):
    """(P*BINS, D) fc weight in PyTorch SPP-flatten order -> (BINS, P, D) indexed by (bin, channel)."""
    D = w_torch_order.shape[1]
    out = np.zeros((BINS, P, D), dtype=np.float64)
    off = 0
    for i in levels:
        sz = i * i
        for s in range(sz):
            for c in range(P):
                out[off + s, c, :] = w_torch_order[P * off + c * sz + s, :]
        off += sz
    return out


def fold_layer_params(wc, bc, w1, b1, H, W, levels):
    """Fold conv(1x1) -> avg-SPP -> fc1 into (W_eff[(C*HW), D] bf16, b_eff[1, D] f32).

    Derivation (per sample, x_flat indexed c*HW + hw):
      y[p, hw]     = sum_c x[c, hw] * wc[c, p] + bc[p]
      pooled[b, p] = sum_hw pool[b, hw] * y[p, hw]           (pool rows sum to 1 -> bias passes)
      h[d]         = sum_{b,p} pooled[b, p] * w1_3d[b, p, d] + b1[d]
                   = sum_{c,hw} x[c, hw] * W_eff[c*HW + hw, d] + b_eff[d]
    """
    assert POOLING_MODE == 'avg', "W_eff/b_eff folding is only valid for average pooling"
    wc64 = np.asarray(wc, np.float64)
    bc64 = np.asarray(bc, np.float64)
    w164 = np.asarray(w1, np.float64)
    b164 = np.asarray(b1, np.float64)
    C, P = wc64.shape
    pool = make_pool_matrix(H, W, levels)                    # (BINS, HW)
    w1_3d = permute_fc1_weight(w164, P, levels)              # (BINS, P, D)
    w_eff = np.einsum('bh,cp,bpd->chd', pool, wc64, w1_3d).reshape(C * H * W, -1)
    b_eff = b164 + np.einsum('p,bpd->d', bc64[0], w1_3d)[None, :]
    # bf16 weights: single-pass MXU on v5e/v6e/v7x and half the weight-DMA bytes.
    return jnp.asarray(w_eff, jnp.bfloat16), jnp.asarray(b_eff, jnp.float32)


# ------------------------------------------ kernel -----------------------------------------------
def _make_fused_kernel(n_layers):
    """Refs: ([x_bf16, W_eff_bf16, b_eff_f32] * n_layers, wf_all_pad_bf16, bf_pad_f32, out_f32)."""
    def kernel(*refs):
        wf_ref = refs[3 * n_layers]              # (D * n_layers, OUT_PAD) bf16
        bf_ref = refs[3 * n_layers + 1]          # (1, OUT_PAD) f32
        o_ref = refs[3 * n_layers + 2]           # (tn, OUT_PAD) f32
        hs = []
        for l in range(n_layers):
            x_ref, w_ref, b_ref = refs[3 * l:3 * l + 3]
            # fc1 of the folded conv->SPP->fc1 chain: bf16 MXU dot, f32 accumulate + bias.
            h = jnp.dot(x_ref[...], w_ref[...],
                        preferred_element_type=jnp.float32) + b_ref[...]
            hs.append(h)
        h_all = jnp.maximum(jnp.concatenate(hs, axis=-1), 0.0)          # (tn, 64) f32, ReLU once
        out = jnp.dot(h_all.astype(jnp.bfloat16), wf_ref[...],          # single K=64 final-fc dot
                      preferred_element_type=jnp.float32)
        o_ref[...] = out + bf_ref[...]
    return kernel


# --------------------------------------- pallas wrapper ------------------------------------------
def audio_neck_forward(x_dict, params, *, batch_tile=BATCH_TILE):
    n_layers = len(LAYERS)
    N = x_dict[LAYERS[0]].shape[0]

    if N <= batch_tile:
        tn, n_pad = N, N                         # one grid step; blocks == full arrays (always legal)
    else:
        tn = batch_tile                          # multiple of 16 -> legal bf16/f32 sublane tiling
        n_pad = ((N + tn - 1) // tn) * tn

    args, in_specs = [], []
    for k in LAYERS:
        x = x_dict[k]
        _, C, H, W = x.shape
        Kl = C * H * W
        x_flat = x.reshape(N, Kl).astype(jnp.bfloat16)       # C-major view matches W_eff row order
        if n_pad != N:
            x_flat = jnp.pad(x_flat, ((0, n_pad - N), (0, 0)))
        p = params[k]
        args += [x_flat, p['w_eff'], p['b_eff']]
        in_specs += [
            pl.BlockSpec((tn, Kl), lambda i: (i, 0)),         # batch-tiled activation (pipelined)
            pl.BlockSpec(p['w_eff'].shape, lambda i: (0, 0)), # weights: constant block, VMEM-resident
            pl.BlockSpec(p['b_eff'].shape, lambda i: (0, 0)),
        ]
    wf = params['final']['wf_all_pad']
    bf = params['final']['bf_pad']
    args += [wf, bf]
    in_specs += [pl.BlockSpec(wf.shape, lambda i: (0, 0)),
                 pl.BlockSpec(bf.shape, lambda i: (0, 0))]

    out = pl.pallas_call(
        _make_fused_kernel(n_layers),
        out_shape=jax.ShapeDtypeStruct((n_pad, OUT_PAD), jnp.float32),
        grid_spec=pltpu.PrefetchScalarGridSpec(
            num_scalar_prefetch=0,
            grid=(n_pad // tn,),
            in_specs=in_specs,
            out_specs=pl.BlockSpec((tn, OUT_PAD), lambda i: (i, 0)),
        ),
        compiler_params=pltpu.CompilerParams(
            dimension_semantics=("parallel",)),   # batch axis: shards across v7x's 2 TCs
    )(*args)
    return out[:N, :OUTPUT_SIZE]


# ----------------------------------- deterministic parameters ------------------------------------
def init_params(key):
    params = {}
    for k in LAYERS:
        C, P = CHANNEL_DICT[k], PLANES[k]
        H, W = SPATIAL[k]
        key, k1, k2, k3, k4 = jax.random.split(key, 5)
        wc = 0.1 * jax.random.normal(k1, (C, P), jnp.float32)   # == Conv2d.weight[:, :, 0, 0].T
        bc = 0.1 * jax.random.normal(k2, (1, P), jnp.float32)
        w1 = 0.1 * jax.random.normal(k3, (P * BINS, FC_HIDDEN_DIM), jnp.float32)  # Linear.weight.T
        b1 = 0.1 * jax.random.normal(k4, (1, FC_HIDDEN_DIM), jnp.float32)
        w_eff, b_eff = fold_layer_params(wc, bc, w1, b1, H, W, SPP_LEVELS)
        params[k] = dict(wc=wc, bc=bc, w1=w1, b1=b1, w_eff=w_eff, b_eff=b_eff)

    key, k5, k6 = jax.random.split(key, 3)
    wf = 0.1 * jax.random.normal(k5, (FC_HIDDEN_DIM * len(LAYERS), OUTPUT_SIZE), jnp.float32)
    bf = 0.1 * jax.random.normal(k6, (1, OUTPUT_SIZE), jnp.float32)

    # Single stacked final-fc weight (rows already in concat-of-layers order), lane-padded to
    # OUT_PAD and cast to bf16; bias kept f32.
    wf_all_pad = jnp.zeros((FC_HIDDEN_DIM * len(LAYERS), OUT_PAD), jnp.float32)
    wf_all_pad = wf_all_pad.at[:, :OUTPUT_SIZE].set(wf).astype(jnp.bfloat16)
    bf_pad = jnp.zeros((1, OUT_PAD), jnp.float32).at[:, :OUTPUT_SIZE].set(bf)
    params['final'] = dict(w=wf, b=bf, wf_all_pad=wf_all_pad, bf_pad=bf_pad)
    return params


# ---------------------------------- pure-JAX reference (check) -----------------------------------
def audio_neck_reference(x_dict, params):
    hp = jax.lax.Precision.HIGHEST
    hiddens = []
    for k in LAYERS:
        x = x_dict[k]
        p = params[k]
        N, C, H, W = x.shape
        P = p['wc'].shape[1]
        y = jnp.einsum('nchw,cp->nphw', x, p['wc'], precision=hp) + p['bc'].reshape(1, P, 1, 1)
        feats = []
        for i in SPP_LEVELS:
            bh, bw = H // i, W // i
            pooled = y.reshape(N, P, i, bh, i, bw).mean(axis=(3, 5))    # adaptive avg pool (i,i)
            feats.append(pooled.reshape(N, P * i * i))                  # channel-major flatten
        feat = jnp.concatenate(feats, axis=-1)
        h = jnp.maximum(jnp.dot(feat, p['w1'], precision=hp) + p['b1'], 0.0)
        hiddens.append(h)
    h_all = jnp.concatenate(hiddens, axis=-1)
    return jnp.dot(h_all, params['final']['w'], precision=hp) + params['final']['b']


# ------------------------------------------- main ------------------------------------------------
if __name__ == "__main__":
    key = jax.random.PRNGKey(0)
    key, kp = jax.random.split(key)
    x = {}
    for k in LAYERS:
        key, kx = jax.random.split(key)
        C = CHANNEL_DICT[k]
        H, W = SPATIAL[k]
        x[k] = jax.random.normal(kx, (2, C, H, W), jnp.float32)   # NCHW, like the PyTorch module
    params = init_params(kp)

    out = audio_neck_forward(x, params)
    out = jax.block_until_ready(out)
    assert out.shape == (2, OUTPUT_SIZE) and out.dtype == jnp.float32

    ref = audio_neck_reference(x, params)
    # bf16 MXU operands with f32 accumulate: ~0.5-1% relative error, well within tolerance.
    np.testing.assert_allclose(np.asarray(out), np.asarray(ref), rtol=2e-2, atol=5e-3)

    print("KERNEL_OK")
</pallas_src>

<mosaic_0001>
module attributes {stable_mosaic.version = 11 : i64} {
  func.func @kernel(%arg0: i32, %arg1: memref<2x2048xbf16, #tpu.memory_space<vmem>>, %arg2: memref<2048x32xbf16, #tpu.memory_space<vmem>>, %arg3: memref<1x32xf32, #tpu.memory_space<vmem>>, %arg4: memref<2x1024xbf16, #tpu.memory_space<vmem>>, %arg5: memref<1024x32xbf16, #tpu.memory_space<vmem>>, %arg6: memref<1x32xf32, #tpu.memory_space<vmem>>, %arg7: memref<64x128xbf16, #tpu.memory_space<vmem>>, %arg8: memref<1x128xf32, #tpu.memory_space<vmem>>, %arg9: memref<2x128xf32, #tpu.memory_space<vmem>>) attributes {dimension_semantics = [#tpu.dimension_semantics<parallel>], iteration_bounds = array<i64: 1>, scalar_prefetch = 0 : i64, scratch_operands = 0 : i64, tpu.core_type = #tpu.core_type<tc>, window_params = [{transform_indices = @transform_0, window_bounds = array<i64: 2, 2048>}, {pipeline_mode = #tpu.pipeline_mode<synchronous>, transform_indices = @transform_1, window_bounds = array<i64: 2048, 32>}, {pipeline_mode = #tpu.pipeline_mode<synchronous>, transform_indices = @transform_2, window_bounds = array<i64: 1, 32>}, {transform_indices = @transform_3, window_bounds = array<i64: 2, 1024>}, {pipeline_mode = #tpu.pipeline_mode<synchronous>, transform_indices = @transform_4, window_bounds = array<i64: 1024, 32>}, {pipeline_mode = #tpu.pipeline_mode<synchronous>, transform_indices = @transform_5, window_bounds = array<i64: 1, 32>}, {pipeline_mode = #tpu.pipeline_mode<synchronous>, transform_indices = @transform_6, window_bounds = array<i64: 64, 128>}, {pipeline_mode = #tpu.pipeline_mode<synchronous>, transform_indices = @transform_7, window_bounds = array<i64: 1, 128>}, {transform_indices = @transform_8, window_bounds = array<i64: 2, 128>}]} {
    %c0 = arith.constant 0 : index
    %c0_0 = arith.constant 0 : index
    %0 = vector.load %arg1[%c0, %c0_0] : memref<2x2048xbf16, #tpu.memory_space<vmem>>, vector<2x2048xbf16>
    %c0_1 = arith.constant 0 : index
    %c0_2 = arith.constant 0 : index
    %1 = vector.load %arg2[%c0_1, %c0_2] : memref<2048x32xbf16, #tpu.memory_space<vmem>>, vector<2048x32xbf16>
    %cst = arith.constant dense<0.000000e+00> : vector<2x32xf32>
    %2 = tpu.matmul %0, %1, %cst {dimension_numbers = #tpu.dot_dimension_numbers<[1], [0], [0], [1], [0, 0, 1, 1], [], []>} : vector<2x2048xbf16>, vector<2048x32xbf16>, vector<2x32xf32> -> vector<2x32xf32>
    %c0_3 = arith.constant 0 : index
    %c0_4 = arith.constant 0 : index
    %3 = vector.load %arg3[%c0_3, %c0_4] : memref<1x32xf32, #tpu.memory_space<vmem>>, vector<1x32xf32>
    %4 = vector.broadcast %3 : vector<1x32xf32> to vector<2x32xf32>
    %5 = arith.addf %2, %4 : vector<2x32xf32>
    %c0_5 = arith.constant 0 : index
    %c0_6 = arith.constant 0 : index
    %6 = vector.load %arg4[%c0_5, %c0_6] : memref<2x1024xbf16, #tpu.memory_space<vmem>>, vector<2x1024xbf16>
    %c0_7 = arith.constant 0 : index
    %c0_8 = arith.constant 0 : index
    %7 = vector.load %arg5[%c0_7, %c0_8] : memref<1024x32xbf16, #tpu.memory_space<vmem>>, vector<1024x32xbf16>
    %cst_9 = arith.constant dense<0.000000e+00> : vector<2x32xf32>
    %8 = tpu.matmul %6, %7, %cst_9 {dimension_numbers = #tpu.dot_dimension_numbers<[1], [0], [0], [1], [0, 0, 1, 1], [], []>} : vector<2x1024xbf16>, vector<1024x32xbf16>, vector<2x32xf32> -> vector<2x32xf32>
    %c0_10 = arith.constant 0 : index
    %c0_11 = arith.constant 0 : index
    %9 = vector.load %arg6[%c0_10, %c0_11] : memref<1x32xf32, #tpu.memory_space<vmem>>, vector<1x32xf32>
    %10 = vector.broadcast %9 : vector<1x32xf32> to vector<2x32xf32>
    %11 = arith.addf %8, %10 : vector<2x32xf32>
    %12 = tpu.concatenate %5, %11 in 1 : vector<2x32xf32>, vector<2x32xf32> -> vector<2x64xf32>
    %cst_12 = arith.constant 0.000000e+00 : f32
    %13 = vector.broadcast %cst_12 : f32 to vector<2x64xf32>
    %14 = arith.maximumf %12, %13 : vector<2x64xf32>
    %15 = arith.truncf %14 : vector<2x64xf32> to vector<2x64xbf16>
    %c0_13 = arith.constant 0 : index
    %c0_14 = arith.constant 0 : index
    %16 = vector.load %arg7[%c0_13, %c0_14] : memref<64x128xbf16, #tpu.memory_space<vmem>>, vector<64x128xbf16>
    %cst_15 = arith.constant dense<0.000000e+00> : vector<2x128xf32>
    %17 = tpu.matmul %15, %16, %cst_15 {dimension_numbers = #tpu.dot_dimension_numbers<[1], [0], [0], [1], [0, 0, 1, 1], [], []>} : vector<2x64xbf16>, vector<64x128xbf16>, vector<2x128xf32> -> vector<2x128xf32>
    %c0_16 = arith.constant 0 : index
    %c0_17 = arith.constant 0 : index
    %18 = vector.load %arg8[%c0_16, %c0_17] : memref<1x128xf32, #tpu.memory_space<vmem>>, vector<1x128xf32>
    %19 = vector.broadcast %18 : vector<1x128xf32> to vector<2x128xf32>
    %20 = arith.addf %17, %19 : vector<2x128xf32>
    %c0_18 = arith.constant 0 : index
    %c0_19 = arith.constant 0 : index
    %21 = vector.load %arg9[%c0_18, %c0_19] : memref<2x128xf32, #tpu.memory_space<vmem>>, vector<2x128xf32>
    tpu.vector_store %arg9[%c0_18, %c0_19], %20 {strides = array<i32>} : memref<2x128xf32, #tpu.memory_space<vmem>>, vector<2x128xf32>,
    return
  }
  func.func @transform_0(%arg0: i32) -> (i32, i32) {
    %c0_i32 = arith.constant 0 : i32
    %c0_i32_0 = arith.constant 0 : i32
    return %arg0, %c0_i32 : i32, i32
  }
  func.func @transform_1(%arg0: i32) -> (i32, i32) {
    %c0_i32 = arith.constant 0 : i32
    %c0_i32_0 = arith.constant 0 : i32
    %c0_i32_1 = arith.constant 0 : i32
    return %c0_i32, %c0_i32_0 : i32, i32
  }
  func.func @transform_2(%arg0: i32) -> (i32, i32) {
    %c0_i32 = arith.constant 0 : i32
    %c0_i32_0 = arith.constant 0 : i32
    %c0_i32_1 = arith.constant 0 : i32
    return %c0_i32, %c0_i32_0 : i32, i32
  }
  func.func @transform_3(%arg0: i32) -> (i32, i32) {
    %c0_i32 = arith.constant 0 : i32
    %c0_i32_0 = arith.constant 0 : i32
    return %arg0, %c0_i32 : i32, i32
  }
  func.func @transform_4(%arg0: i32) -> (i32, i32) {
    %c0_i32 = arith.constant 0 : i32
    %c0_i32_0 = arith.constant 0 : i32
    %c0_i32_1 = arith.constant 0 : i32
    return %c0_i32, %c0_i32_0 : i32, i32
  }
  func.func @transform_5(%arg0: i32) -> (i32, i32) {
    %c0_i32 = arith.constant 0 : i32
    %c0_i32_0 = arith.constant 0 : i32
    %c0_i32_1 = arith.constant 0 : i32
    return %c0_i32, %c0_i32_0 : i32, i32
  }
  func.func @transform_6(%arg0: i32) -> (i32, i32) {
    %c0_i32 = arith.constant 0 : i32
    %c0_i32_0 = arith.constant 0 : i32
    %c0_i32_1 = arith.constant 0 : i32
    return %c0_i32, %c0_i32_0 : i32, i32
  }
  func.func @transform_7(%arg0: i32) -> (i32, i32) {
    %c0_i32 = arith.constant 0 : i32
    %c0_i32_0 = arith.constant 0 : i32
    %c0_i32_1 = arith.constant 0 : i32
    return %c0_i32, %c0_i32_0 : i32, i32
  }
  func.func @transform_8(%arg0: i32) -> (i32, i32) {
    %c0_i32 = arith.constant 0 : i32
    %c0_i32_0 = arith.constant 0 : i32
    return %arg0, %c0_i32 : i32, i32
  }
}

</mosaic_0001>

<bundles_post_ra>
// kernel: tpu_custom_call.1
= control target key start
LH: loop header
LB: loop body
LE: loop exit
PB: predicated region body
PF: predicated region fallthrough
CT: control target
= control target key end

     0   :  { %v302_v28 = vlaneseq  ;;  %v3053_v36 = vmov 1966171168   ;;  %s3756_s0 = inlined_call_operand.vmem [shape: bf16[2,2048], index: 0, kind: input, shape index: {}]   ;;  %s3757_s1 = inlined_call_operand.vmem [shape: bf16[2048,32], index: 1, kind: input, shape index: {}]   ;;  %s3758_s2 = inlined_call_operand.vmem [shape: f32[1,32], index: 2, kind: input, shape index: {}]   ;;  %s3759_s3 = inlined_call_operand.vmem [shape: bf16[2,1024], index: 3, kind: input, shape index: {}]   ;;  %s3760_s4 = inlined_call_operand.vmem [shape: bf16[1024,32], index: 4, kind: input, shape index: {}]   ;;  %s3761_s5 = inlined_call_operand.vmem [shape: f32[1,32], index: 5, kind: input, shape index: {}]   ;;  %s3762_s6 = inlined_call_operand.vmem [shape: bf16[64,128], index: 6, kind: input, shape index: {}]   ;;  %s3763_s7 = inlined_call_operand.vmem [shape: f32[1,128], index: 7, kind: input, shape index: {}]   ;;  %s3764_s8 = inlined_call_operand.hbm [shape: f32[2,128], index: 8, kind: output, shape index: {}]  }
   0x1   :  { %v2830_v0 = vld [vmem:[%s3757_s1 + $0x40] sm:$0xff]   ;;  %v2834_v4 = vld [vmem:[%s3757_s1 + $0x48] sm:$0xff]   ;;  %v2838_v8 = vld [vmem:[%s3757_s1 + $0x50] sm:$0xff]   ;;  %v300_v37 = vunpack.c.l.s4 %v3053_v36 }
   0x2   :  { %v2831_v1 = vld [vmem:[%s3757_s1 + $0xc0] sm:$0xff]   ;;  %2544 = vmatprep.subr.bf16.mxu0 %v2830_v0  ;;  %v2835_v5 = vld [vmem:[%s3757_s1 + $0xc8] sm:$0xff]   ;;  %v2839_v9 = vld [vmem:[%s3757_s1 + $0xd0] sm:$0xff]   ;;  %v303_v33 = vshrl.u32 %v302_v28, 7 }
   0x3   :  { %v2832_v2 = vld [vmem:[%s3757_s1] sm:$0xff]   ;;  %2566 = vmatprep.subr.bf16.mxu1 %v2831_v1  ;;  %v2836_v6 = vld [vmem:[%s3757_s1 + $0x8] sm:$0xff]   ;;  %v2840_v10 = vld [vmem:[%s3757_s1 + $0x10] sm:$0xff]   ;;  %v301_v40 = vunpack.c.0.s8 %v300_v37 }
   0x4   :  { %v2833_v3 = vld [vmem:[%s3757_s1 + $0x80] sm:$0xff]   ;;  %2545 = vmatpush3.bf16.msra.mxu0 %v2832_v2  ;;  %v2837_v7 = vld [vmem:[%s3757_s1 + $0x88] sm:$0xff]   ;;  %v2841_v11 = vld [vmem:[%s3757_s1 + $0x90] sm:$0xff]  }
   0x5   :  { %2567 = vmatpush3.bf16.msra.mxu1 %v2833_v3  ;;  %2546 = vmatprep.subr.bf16.mxu0 %v2834_v4  ;;  %v2842_v12 = vld [vmem:[%s3757_s1 + $0x58] sm:$0xff]   ;;  %v2846_v16 = vld [vmem:[%s3757_s1 + $0x60] sm:$0xff]   ;;  %v2850_v20 = vld [vmem:[%s3757_s1 + $0x68] sm:$0xff]   ;;  %v3208_v41 = vsub.s32 %v301_v40, %v303_v33 }
   0x6   :  { %2568 = vmatprep.subr.bf16.mxu1 %v2835_v5  ;;  %v2843_v13 = vld [vmem:[%s3757_s1 + $0xd8] sm:$0xff]   ;;  %v2847_v17 = vld [vmem:[%s3757_s1 + $0xe0] sm:$0xff]   ;;  %v2851_v21 = vld [vmem:[%s3757_s1 + $0xe8] sm:$0xff]  }
   0x7   :  { %v2844_v14 = vld [vmem:[%s3757_s1 + $0x18] sm:$0xff]   ;;  %v2848_v18 = vld [vmem:[%s3757_s1 + $0x20] sm:$0xff]   ;;  %v2852_v22 = vld [vmem:[%s3757_s1 + $0x28] sm:$0xff]  }
   0x8   :  { %2547 = vmatpush3.bf16.msra.mxu0 %v2836_v6  ;;  %v2845_v15 = vld [vmem:[%s3757_s1 + $0x98] sm:$0xff]   ;;  %v2849_v19 = vld [vmem:[%s3757_s1 + $0xa0] sm:$0xff]   ;;  %v2853_v23 = vld [vmem:[%s3757_s1 + $0xa8] sm:$0xff]  }
   0x9   :  { %2569 = vmatpush3.bf16.msra.mxu1 %v2837_v7  ;;  %2548 = vmatprep.subr.bf16.mxu0 %v2838_v8  ;;  %v2854_v24 = vld [vmem:[%s3757_s1 + $0x70] sm:$0xff]   ;;  %v2858_v29 = vld [vmem:[%s3757_s1 + $0x78] sm:$0xff]   ;;  %v31_v34 = vld [vmem:[%s3756_s0] sm:$0xff] }
   0xa   :  { %2570 = vmatprep.subr.bf16.mxu1 %v2839_v9  ;;  %v2855_v25 = vld [vmem:[%s3757_s1 + $0xf0] sm:$0xff]   ;;  %v2859_v30 = vld [vmem:[%s3757_s1 + $0xf8] sm:$0xff]   ;;  %v2863_v35 = vld [vmem:[%s3757_s1 + $0x140] sm:$0xff]   ;;  %v298_v39 = vcombine.high %v31_v34, %v31_v34  ;;  %v305_v42 = vrot.slane %v31_v34, %v3208_v41 }
   0xb   :  { %v2856_v26 = vld [vmem:[%s3757_s1 + $0x30] sm:$0xff]   ;;  %v2860_v31 = vld [vmem:[%s3757_s1 + $0x38] sm:$0xff]   ;;  %v2864_v38 = vld [vmem:[%s3757_s1 + $0x1c0] sm:$0xff]  }
   0xc   :  { %2549 = vmatpush3.bf16.msra.mxu0 %v2840_v10  ;;  %v2857_v27 = vld [vmem:[%s3757_s1 + $0xb0] sm:$0xff]   ;;  %v2861_v32 = vld [vmem:[%s3757_s1 + $0xb8] sm:$0xff]   ;;  %v3212_v43 = vrot.slane %v298_v39, %v3208_v41  ;;  %v313_v44 = vcombine.high %v305_v42, %v305_v42  ;;  %v321_v45 = vrot.slane %v305_v42, %v3208_v41  ;;  %v2865_v47 = vld [vmem:[%s3757_s1 + $0x100] sm:$0xff]  }
   0xd   :  { %2571 = vmatpush3.bf16.msra.mxu1 %v2841_v11  ;;  %2550 = vmatprep.subr.bf16.mxu0 %v2842_v12  ;;  %v2866_v49 = vld [vmem:[%s3757_s1 + $0x180] sm:$0xff]   ;;  %v2867_v52 = vld [vmem:[%s3757_s1 + $0x148] sm:$0xff]   ;;  %v2871_v58 = vld [vmem:[%s3757_s1 + $0x150] sm:$0xff]  }
   0xe   :  { %2572 = vmatprep.subr.bf16.mxu1 %v2843_v13  ;;  %v314_v46 = vcombine.high %v3212_v43, %v3212_v43  ;;  %v335_v48 = vrot.slane %v313_v44, %v3208_v41  ;;  %v343_v51 = vcombine.high %v321_v45, %v321_v45  ;;  %v2868_v54 = vld [vmem:[%s3757_s1 + $0x1c8] sm:$0xff]   ;;  %v2872_v59 = vld [vmem:[%s3757_s1 + $0x1d0] sm:$0xff]   ;;  %v2875_v62 = vld [vmem:[%s3757_s1 + $0x158] sm:$0xff]  }
   0xf   :  { %v2869_v55 = vld [vmem:[%s3757_s1 + $0x108] sm:$0xff]   ;;  %v2873_v60 = vld [vmem:[%s3757_s1 + $0x110] sm:$0xff]   ;;  %v2876_v63 = vld [vmem:[%s3757_s1 + $0x1d8] sm:$0xff]  }
  0x10   :  { %2551 = vmatpush3.bf16.msra.mxu0 %v2844_v14  ;;  %v342_v50 = vrot.slane %v314_v46, %v3208_v41  ;;  %1212 = vmatprep.mubr.bf16.mxu0 %v335_v48  ;;  %v345_v53 = vcombine.high %v335_v48, %v335_v48  ;;  %v2870_v57 = vld [vmem:[%s3757_s1 + $0x188] sm:$0xff]   ;;  %v2874_v61 = vld [vmem:[%s3757_s1 + $0x190] sm:$0xff]   ;;  %v2877_v0 = vld [vmem:[%s3757_s1 + $0x118] sm:$0xff]  }
  0x11   :  { %2573 = vmatpush3.bf16.msra.mxu1 %v2845_v15  ;;  %2552 = vmatprep.subr.bf16.mxu0 %v2846_v16  ;;  %v2878_v1 = vld [vmem:[%s3757_s1 + $0x198] sm:$0xff]   ;;  %v2879_v2 = vld [vmem:[%s3757_s1 + $0x160] sm:$0xff]   ;;  %v2883_v6 = vld [vmem:[%s3757_s1 + $0x168] sm:$0xff]  }
  0x12   :  { %2574 = vmatprep.subr.bf16.mxu1 %v2847_v17  ;;  %v346_v56 = vcombine.high %v342_v50, %v342_v50  ;;  %1252 = vmatprep.mubr.bf16.mxu1 %v345_v53  ;;  %v2880_v3 = vld [vmem:[%s3757_s1 + $0x1e0] sm:$0xff]   ;;  %v2884_v7 = vld [vmem:[%s3757_s1 + $0x1e8] sm:$0xff]   ;;  %v2887_v10 = vld [vmem:[%s3757_s1 + $0x170] sm:$0xff]  }
  0x13   :  { %v2881_v4 = vld [vmem:[%s3757_s1 + $0x120] sm:$0xff]   ;;  %v2885_v8 = vld [vmem:[%s3757_s1 + $0x128] sm:$0xff]   ;;  %v2888_v11 = vld [vmem:[%s3757_s1 + $0x1f0] sm:$0xff]  }
  0x14   :  { %2553 = vmatpush3.bf16.msra.mxu0 %v2848_v18  ;;  %v2882_v5 = vld [vmem:[%s3757_s1 + $0x1a0] sm:$0xff]   ;;  %v2886_v9 = vld [vmem:[%s3757_s1 + $0x1a8] sm:$0xff]   ;;  %v2889_v12 = vld [vmem:[%s3757_s1 + $0x130] sm:$0xff]   ;;  %v328_v18 = vrot.slane %v3212_v43, %v3208_v41 }
  0x15   :  { %2575 = vmatpush3.bf16.msra.mxu1 %v2849_v19  ;;  %2554 = vmatprep.subr.bf16.mxu0 %v2850_v20  ;;  %v2890_v13 = vld [vmem:[%s3757_s1 + $0x1b0] sm:$0xff]   ;;  %v2891_v14 = vld [vmem:[%s3757_s1 + $0x178] sm:$0xff]   ;;  %v2895_v19 = vld [vmem:[%s3757_s1 + $0x240] sm:$0xff]  }
  0x16   :  { %2576 = vmatprep.subr.bf16.mxu1 %v2851_v21  ;;  %v2892_v15 = vld [vmem:[%s3757_s1 + $0x1f8] sm:$0xff]   ;;  %v2896_v20 = vld [vmem:[%s3757_s1 + $0x2c0] sm:$0xff]   ;;  %v2903_v28 = vld [vmem:[%s3757_s1 + $0x250] sm:$0xff]  }
  0x17   :  { %v2893_v16 = vld [vmem:[%s3757_s1 + $0x138] sm:$0xff]   ;;  %v2897_v21 = vld [vmem:[%s3757_s1 + $0x200] sm:$0xff]   ;;  %v2915_v40 = vld [vmem:[%s3757_s1 + $0x268] sm:$0xff]  }
  0x18   :  { %2555 = vmatpush3.bf16.msra.mxu0 %v2852_v22  ;;  %v2894_v17 = vld [vmem:[%s3757_s1 + $0x1b8] sm:$0xff]   ;;  %v2898_v22 = vld [vmem:[%s3757_s1 + $0x280] sm:$0xff]   ;;  %v2916_v42 = vld [vmem:[%s3757_s1 + $0x2e8] sm:$0xff]  }
  0x19   :  { %2577 = vmatpush3.bf16.msra.mxu1 %v2853_v23  ;;  %2556 = vmatprep.subr.bf16.mxu0 %v2854_v24  ;;  %v344_v23 = vcombine.high %v328_v18, %v328_v18  ;;  %v2899_v24 = vld [vmem:[%s3757_s1 + $0x248] sm:$0xff]   ;;  %v2908_v33 = vld [vmem:[%s3757_s1 + $0x2d8] sm:$0xff]   ;;  %v2911_v36 = vld [vmem:[%s3757_s1 + $0x260] sm:$0xff]  }
  0x1a   :  { %2578 = vmatprep.subr.bf16.mxu1 %v2855_v25  ;;  %v2900_v25 = vld [vmem:[%s3757_s1 + $0x2c8] sm:$0xff]   ;;  %v2909_v34 = vld [vmem:[%s3757_s1 + $0x218] sm:$0xff]   ;;  %v2912_v37 = vld [vmem:[%s3757_s1 + $0x2e0] sm:$0xff]  }
  0x1b   :  { %v2914_v39 = vld [vmem:[%s3757_s1 + $0x2a0] sm:$0xff]   ;;  %v2917_v43 = vld [vmem:[%s3757_s1 + $0x228] sm:$0xff]  }
  0x1c   :  { %2557 = vmatpush3.bf16.msra.mxu0 %v2856_v26  ;;  %v2901_v26 = vld [vmem:[%s3757_s1 + $0x208] sm:$0xff]  }
  0x1d   :  { %2579 = vmatpush3.bf16.msra.mxu1 %v2857_v27  ;;  %2558 = vmatprep.subr.bf16.mxu0 %v2858_v29  ;;  %v2902_v27 = vld [vmem:[%s3757_s1 + $0x288] sm:$0xff]   ;;  %v2904_v29 = vld [vmem:[%s3757_s1 + $0x2d0] sm:$0xff]  }
  0x1e   :  { %2580 = vmatprep.subr.bf16.mxu1 %v2859_v30  ;;  %v2905_v30 = vld [vmem:[%s3757_s1 + $0x210] sm:$0xff]   ;;  %v2918_v44 = vld [vmem:[%s3757_s1 + $0x2a8] sm:$0xff]  }
  0x1f   :  { %v32_v46 = vld [vmem:[%s3756_s0 + $0x8] sm:$0xff] }
  0x20   :  { %2559 = vmatpush3.bf16.msra.mxu0 %v2860_v31  ;;  %v2906_v31 = vld [vmem:[%s3757_s1 + $0x290] sm:$0xff]   ;;  %v354_v48 = vrot.slane %v32_v46, %v3208_v41 }
  0x21   :  { %2581 = vmatpush3.bf16.msra.mxu1 %v2861_v32  ;;  %2588 = vmatprep.subr.bf16.mxu0 %v2863_v35  ;;  %v2907_v32 = vld [vmem:[%s3757_s1 + $0x258] sm:$0xff]  }
  0x22   :  { %2610 = vmatprep.subr.bf16.mxu1 %v2864_v38  ;;  %v2910_v35 = vld [vmem:[%s3757_s1 + $0x298] sm:$0xff]   ;;  %v2913_v38 = vld [vmem:[%s3757_s1 + $0x220] sm:$0xff]  }
  0x23   :  { %1213 = vmatmul.mubr.bf16.vlgmr.msra.gmra.mrb[0].mxu0 %v321_v45  ;;  %v2919_v45 = vld [vmem:[%s3757_s1 + $0x270] sm:$0xff]  }
  0x24   :  { %2589 = vmatpush3.bf16.msra.mxu0 %v2865_v47  ;;  %1253 = vmatmul.mubr.bf16.vlgmr.msra.gmra.mrb[0].mxu1 %v343_v51  ;;  %v2920_v47 = vld [vmem:[%s3757_s1 + $0x2f0] sm:$0xff]  }
  0x25   :  { %2590 = vmatprep.subr.bf16.mxu0 %v2867_v52  ;;  %2611 = vmatpush3.bf16.msra.mxu1 %v2866_v49  ;;  %v347_v49 = vcombine.high %v32_v46, %v32_v46  ;;  %v2922_v51 = vld [vmem:[%s3757_s1 + $0x2b0] sm:$0xff]   ;;  %v362_v52 = vcombine.high %v354_v48, %v354_v48 }
  0x26   :  { %1292 = vmatprep.mubr.bf16.mxu0 %v342_v50  ;;  %2612 = vmatprep.subr.bf16.mxu1 %v2868_v54  ;;  %v2921_v50 = vld [vmem:[%s3757_s1 + $0x230] sm:$0xff]   ;;  %v2923_v54 = vld [vmem:[%s3757_s1 + $0x278] sm:$0xff]  }
  0x27   :  { %1332 = vmatprep.mubr.bf16.mxu1 %v346_v56  ;;  %v3400_v53 = vrot.slane %v347_v49, %v3208_v41  ;;  %v384_v56 = vrot.slane %v362_v52, %v3208_v41  ;;  %v2970_v46 = vld [vmem:[%s3760_s4 + $0x10] sm:$0xff]   ;;  %v2973_v49 = vld [vmem:[%s3760_s4 + $0xd8] sm:$0xff]   ;;  %v2976_v52 = vld [vmem:[%s3760_s4 + $0x60] sm:$0xff]  }
  0x28   :  { %2591 = vmatpush3.bf16.msra.mxu0 %v2869_v55  ;;  %v2924_v55 = vld [vmem:[%s3757_s1 + $0x2f8] sm:$0xff]  }
  0x29   :  { %2592 = vmatprep.subr.bf16.mxu0 %v2871_v58  ;;  %2613 = vmatpush3.bf16.msra.mxu1 %v2870_v57  ;;  %v363_v57 = vcombine.high %v3400_v53, %v3400_v53  ;;  %v2925_v58 = vld [vmem:[%s3757_s1 + $0x238] sm:$0xff]  }
  0x2a   :  { %2614 = vmatprep.subr.bf16.mxu1 %v2872_v59  ;;  %v2926_v59 = vld [vmem:[%s3757_s1 + $0x2b8] sm:$0xff]  }
  0x2c   :  { %2593 = vmatpush3.bf16.msra.mxu0 %v2873_v60  ;;  %v394_v60 = vcombine.high %v384_v56, %v384_v56 }
  0x2d   :  { %2594 = vmatprep.subr.bf16.mxu0 %v2875_v62  ;;  %2615 = vmatpush3.bf16.msra.mxu1 %v2874_v61  ;;  %v370_v61 = vrot.slane %v354_v48, %v3208_v41  ;;  %v2927_v62 = vld [vmem:[%s3757_s1 + $0x340] sm:$0xff]   ;;  %v2972_v48 = vld [vmem:[%s3760_s4 + $0x58] sm:$0xff]  }
  0x2e   :  { %2616 = vmatprep.subr.bf16.mxu1 %v2876_v63  ;;  %v2928_v63 = vld [vmem:[%s3757_s1 + $0x3c0] sm:$0xff]  }
  0x30   :  { %2595 = vmatpush3.bf16.msra.mxu0 %v2877_v0  ;;  %v391_v0 = vrot.slane %v363_v57, %v3208_v41  ;;  %v2981_v57 = vld [vmem:[%s3760_s4 + $0xe8] sm:$0xff]  }
  0x31   :  { %2596 = vmatprep.subr.bf16.mxu0 %v2879_v2  ;;  %2617 = vmatpush3.bf16.msra.mxu1 %v2878_v1  ;;  %v2929_v1 = vld [vmem:[%s3757_s1 + $0x300] sm:$0xff]  }
  0x32   :  { %2618 = vmatprep.subr.bf16.mxu1 %v2880_v3  ;;  %v2930_v2 = vld [vmem:[%s3757_s1 + $0x380] sm:$0xff]   ;;  %v392_v3 = vcombine.high %v370_v61, %v370_v61 }
  0x34   :  { %2597 = vmatpush3.bf16.msra.mxu0 %v2881_v4  ;;  %v2931_v4 = vld [vmem:[%s3757_s1 + $0x348] sm:$0xff]  }
  0x35   :  { %2598 = vmatprep.subr.bf16.mxu0 %v2883_v6  ;;  %2619 = vmatpush3.bf16.msra.mxu1 %v2882_v5  ;;  %v2932_v5 = vld [vmem:[%s3757_s1 + $0x3c8] sm:$0xff]   ;;  %v395_v6 = vcombine.high %v391_v0, %v391_v0 }
  0x36   :  { %2620 = vmatprep.subr.bf16.mxu1 %v2884_v7  ;;  %v2933_v7 = vld [vmem:[%s3757_s1 + $0x308] sm:$0xff]  }
  0x38   :  { %2599 = vmatpush3.bf16.msra.mxu0 %v2885_v8  ;;  %v2934_v8 = vld [vmem:[%s3757_s1 + $0x388] sm:$0xff]  }
  0x39   :  { %2600 = vmatprep.subr.bf16.mxu0 %v2887_v10  ;;  %2621 = vmatpush3.bf16.msra.mxu1 %v2886_v9  ;;  %v2935_v9 = vld [vmem:[%s3757_s1 + $0x350] sm:$0xff]  }
  0x3a   :  { %2622 = vmatprep.subr.bf16.mxu1 %v2888_v11  ;;  %v2936_v10 = vld [vmem:[%s3757_s1 + $0x3d0] sm:$0xff]  }
  0x3b   :  { %v2937_v11 = vld [vmem:[%s3757_s1 + $0x310] sm:$0xff]  }
  0x3c   :  { %2601 = vmatpush3.bf16.msra.mxu0 %v2889_v12  ;;  %v2938_v12 = vld [vmem:[%s3757_s1 + $0x390] sm:$0xff]  }
  0x3d   :  { %2602 = vmatprep.subr.bf16.mxu0 %v2891_v14  ;;  %2623 = vmatpush3.bf16.msra.mxu1 %v2890_v13  ;;  %v2939_v13 = vld [vmem:[%s3757_s1 + $0x358] sm:$0xff]  }
  0x3e   :  { %2624 = vmatprep.subr.bf16.mxu1 %v2892_v15  ;;  %v2940_v14 = vld [vmem:[%s3757_s1 + $0x3d8] sm:$0xff]  }
  0x3f   :  { %v2941_v15 = vld [vmem:[%s3757_s1 + $0x318] sm:$0xff]  }
  0x40   :  { %2603 = vmatpush3.bf16.msra.mxu0 %v2893_v16  ;;  %v2942_v16 = vld [vmem:[%s3757_s1 + $0x398] sm:$0xff]  }
  0x41   :  { %2632 = vmatprep.subr.bf16.mxu0 %v2895_v19  ;;  %2625 = vmatpush3.bf16.msra.mxu1 %v2894_v17  ;;  %v2943_v17 = vld [vmem:[%s3757_s1 + $0x360] sm:$0xff]  }
  0x42   :  { %2654 = vmatprep.subr.bf16.mxu1 %v2896_v20  ;;  %v2945_v19 = vld [vmem:[%s3757_s1 + $0x320] sm:$0xff]  }
  0x43   :  { %1293 = vmatmul.mubr.bf16.vlgmr.msra.gmra.mrb[4].mxu0 %v328_v18  ;;  %v2944_v18 = vld [vmem:[%s3757_s1 + $0x3e0] sm:$0xff]  }
  0x44   :  { %2633 = vmatpush3.bf16.msra.mxu0 %v2897_v21  ;;  %1333 = vmatmul.mubr.bf16.vlgmr.msra.gmra.mrb[4].mxu1 %v344_v23  ;;  %v2946_v20 = vld [vmem:[%s3757_s1 + $0x3a0] sm:$0xff]   ;;  %v2947_v21 = vld [vmem:[%s3757_s1 + $0x368] sm:$0xff]  }
  0x45   :  { %2634 = vmatprep.subr.bf16.mxu0 %v2899_v24  ;;  %2655 = vmatpush3.bf16.msra.mxu1 %v2898_v22  ;;  %v2948_v22 = vld [vmem:[%s3757_s1 + $0x3e8] sm:$0xff]  }
  0x46   :  { %2656 = vmatprep.subr.bf16.mxu1 %v2900_v25  ;;  %1372 = vmatprep.mubr.bf16.mxu0 %v384_v56  ;;  %v2949_v23 = vld [vmem:[%s3757_s1 + $0x328] sm:$0xff]   ;;  %v2951_v25 = vld [vmem:[%s3757_s1 + $0x370] sm:$0xff]  }
  0x47   :  { %1412 = vmatprep.mubr.bf16.mxu1 %v394_v60  ;;  %v2950_v24 = vld [vmem:[%s3757_s1 + $0x3a8] sm:$0xff]   ;;  %v2984_v60 = vld [vmem:[%s3760_s4 + $0x70] sm:$0xff]  }
  0x48   :  { %2635 = vmatpush3.bf16.msra.mxu0 %v2901_v26  ;;  %v2952_v26 = vld [vmem:[%s3757_s1 + $0x3f0] sm:$0xff]   ;;  %v2980_v56 = vld [vmem:[%s3760_s4 + $0x68] sm:$0xff]  }
  0x49   :  { %2636 = vmatprep.subr.bf16.mxu0 %v2903_v28  ;;  %2657 = vmatpush3.bf16.msra.mxu1 %v2902_v27  ;;  %v2953_v27 = vld [vmem:[%s3757_s1 + $0x330] sm:$0xff]  }
  0x4a   :  { %2658 = vmatprep.subr.bf16.mxu1 %v2904_v29  ;;  %v2954_v28 = vld [vmem:[%s3757_s1 + $0x3b0] sm:$0xff]   ;;  %v2955_v29 = vld [vmem:[%s3757_s1 + $0x378] sm:$0xff]  }
  0x4c   :  { %2637 = vmatpush3.bf16.msra.mxu0 %v2905_v30  ;;  %v2956_v30 = vld [vmem:[%s3757_s1 + $0x3f8] sm:$0xff]  }
  0x4d   :  { %2638 = vmatprep.subr.bf16.mxu0 %v2907_v32  ;;  %2659 = vmatpush3.bf16.msra.mxu1 %v2906_v31  ;;  %v2957_v31 = vld [vmem:[%s3757_s1 + $0x338] sm:$0xff]  }
  0x4e   :  { %2660 = vmatprep.subr.bf16.mxu1 %v2908_v33  ;;  %v2958_v32 = vld [vmem:[%s3757_s1 + $0x3b8] sm:$0xff]   ;;  %v377_v33 = vrot.slane %v3400_v53, %v3208_v41  ;;  %v2977_v53 = vld [vmem:[%s3760_s4 + $0xe0] sm:$0xff]  }
  0x50   :  { %2639 = vmatpush3.bf16.msra.mxu0 %v2909_v34  ;;  %v2960_v34 = vld [vmem:[%s3760_s4 + $0x40] sm:$0xff]  }
  0x51   :  { %2640 = vmatprep.subr.bf16.mxu0 %v2911_v36  ;;  %2661 = vmatpush3.bf16.msra.mxu1 %v2910_v35  ;;  %v2961_v35 = vld [vmem:[%s3760_s4 + $0xc0] sm:$0xff]  }
  0x52   :  { %2662 = vmatprep.subr.bf16.mxu1 %v2912_v37  ;;  %v2962_v36 = vld [vmem:[%s3760_s4] sm:$0xff]  }
  0x53   :  { %v2963_v37 = vld [vmem:[%s3760_s4 + $0x80] sm:$0xff]  }
  0x54   :  { %2641 = vmatpush3.bf16.msra.mxu0 %v2913_v38  ;;  %v393_v38 = vcombine.high %v377_v33, %v377_v33 }
  0x55   :  { %2642 = vmatprep.subr.bf16.mxu0 %v2915_v40  ;;  %2663 = vmatpush3.bf16.msra.mxu1 %v2914_v39  ;;  %v2964_v39 = vld [vmem:[%s3760_s4 + $0x48] sm:$0xff]  }
  0x56   :  { %2664 = vmatprep.subr.bf16.mxu1 %v2916_v42  ;;  %v2965_v40 = vld [vmem:[%s3760_s4 + $0xc8] sm:$0xff]  }
  0x57   :  { %v2966_v42 = vld [vmem:[%s3760_s4 + $0x8] sm:$0xff]  }
  0x58   :  { %2643 = vmatpush3.bf16.msra.mxu0 %v2917_v43  ;;  %v2967_v43 = vld [vmem:[%s3760_s4 + $0x88] sm:$0xff]  }
  0x59   :  { %2644 = vmatprep.subr.bf16.mxu0 %v2919_v45  ;;  %2665 = vmatpush3.bf16.msra.mxu1 %v2918_v44  ;;  %v2968_v44 = vld [vmem:[%s3760_s4 + $0x50] sm:$0xff]  }
  0x5a   :  { %2666 = vmatprep.subr.bf16.mxu1 %v2920_v47  ;;  %v2969_v45 = vld [vmem:[%s3760_s4 + $0xd0] sm:$0xff]  }
  0x5b   :  { %v2971_v47 = vld [vmem:[%s3760_s4 + $0x90] sm:$0xff]  }
  0x5c   :  { %2645 = vmatpush3.bf16.msra.mxu0 %v2921_v50  ;;  %v2974_v50 = vld [vmem:[%s3760_s4 + $0x18] sm:$0xff]  }
  0x5d   :  { %2646 = vmatprep.subr.bf16.mxu0 %v2923_v54  ;;  %2667 = vmatpush3.bf16.msra.mxu1 %v2922_v51  ;;  %v2975_v51 = vld [vmem:[%s3760_s4 + $0x98] sm:$0xff]   ;;  %v2978_v54 = vld [vmem:[%s3760_s4 + $0x20] sm:$0xff]  }
  0x5e   :  { %2668 = vmatprep.subr.bf16.mxu1 %v2924_v55  ;;  %v2979_v55 = vld [vmem:[%s3760_s4 + $0xa0] sm:$0xff]  }
  0x60   :  { %2647 = vmatpush3.bf16.msra.mxu0 %v2925_v58  ;;  %v2982_v58 = vld [vmem:[%s3760_s4 + $0x28] sm:$0xff]  }
  0x61   :  { %2676 = vmatprep.subr.bf16.mxu0 %v2927_v62  ;;  %2669 = vmatpush3.bf16.msra.mxu1 %v2926_v59  ;;  %v2983_v59 = vld [vmem:[%s3760_s4 + $0xa8] sm:$0xff]   ;;  %v2985_v62 = vld [vmem:[%s3760_s4 + $0xf0] sm:$0xff]  }
  0x62   :  { %2698 = vmatprep.subr.bf16.mxu1 %v2928_v63 }
  0x63   :  { %1373 = vmatmul.mubr.bf16.vlgmr.msra.gmra.mrb[8].mxu0 %v370_v61  ;;  %v1500_v61 = vld [vmem:[%s3759_s3] sm:$0xff] }
  0x64   :  { %2677 = vmatpush3.bf16.msra.mxu0 %v2929_v1  ;;  %1452 = vmatprep.mubr.bf16.mxu0 %v391_v0  ;;  %v1644_v63 = vrot.slane %v1500_v61, %v3208_v41  ;;  %v1637_v0 = vcombine.high %v1500_v61, %v1500_v61  ;;  %v2986_v1 = vld [vmem:[%s3760_s4 + $0x30] sm:$0xff]  }
  0x65   :  { %1413 = vmatmul.mubr.bf16.vlgmr.msra.gmra.mrb[8].mxu1 %v392_v3  ;;  %2678 = vmatprep.subr.bf16.mxu0 %v2931_v4 }
  0x66   :  { %2699 = vmatpush3.bf16.msra.mxu1 %v2930_v2  ;;  %1492 = vmatprep.mubr.bf16.mxu1 %v395_v6  ;;  %v2987_v2 = vld [vmem:[%s3760_s4 + $0xb0] sm:$0xff]   ;;  %v1652_v3 = vcombine.high %v1644_v63, %v1644_v63  ;;  %v3606_v4 = vrot.slane %v1637_v0, %v3208_v41  ;;  %v2989_v6 = vld [vmem:[%s3760_s4 + $0xf8] sm:$0xff]  }
  0x67   :  { %2700 = vmatprep.subr.bf16.mxu1 %v2932_v5  ;;  %v2988_v5 = vld [vmem:[%s3760_s4 + $0x78] sm:$0xff]  }
  0x68   :  { %2679 = vmatpush3.bf16.msra.mxu0 %v2933_v7  ;;  %v1674_v7 = vrot.slane %v1652_v3, %v3208_v41 }
  0x69   :  { %2680 = vmatprep.subr.bf16.mxu0 %v2935_v9  ;;  %v2990_v9 = vld [vmem:[%s3760_s4 + $0x38] sm:$0xff]  }
  0x6a   :  { %2701 = vmatpush3.bf16.msra.mxu1 %v2934_v8  ;;  %v1653_v8 = vcombine.high %v3606_v4, %v3606_v4 }
  0x6b   :  { %2702 = vmatprep.subr.bf16.mxu1 %v2936_v10  ;;  %v2991_v10 = vld [vmem:[%s3760_s4 + $0xb8] sm:$0xff]  }
  0x6c   :  { %2681 = vmatpush3.bf16.msra.mxu0 %v2937_v11  ;;  %v1684_v11 = vcombine.high %v1674_v7, %v1674_v7 }
  0x6d   :  { %2682 = vmatprep.subr.bf16.mxu0 %v2939_v13  ;;  %v2992_v13 = vld [vmem:[%s3760_s4 + $0x140] sm:$0xff]  }
  0x6e   :  { %2703 = vmatpush3.bf16.msra.mxu1 %v2938_v12  ;;  %v1660_v12 = vrot.slane %v1644_v63, %v3208_v41 }
  0x6f   :  { %2704 = vmatprep.subr.bf16.mxu1 %v2940_v14  ;;  %v2993_v14 = vld [vmem:[%s3760_s4 + $0x1c0] sm:$0xff]  }
  0x70   :  { %2683 = vmatpush3.bf16.msra.mxu0 %v2941_v15  ;;  %v1681_v15 = vrot.slane %v1653_v8, %v3208_v41 }
  0x71   :  { %2684 = vmatprep.subr.bf16.mxu0 %v2943_v17  ;;  %v2995_v17 = vld [vmem:[%s3760_s4 + $0x180] sm:$0xff]  }
  0x72   :  { %2705 = vmatpush3.bf16.msra.mxu1 %v2942_v16  ;;  %v2994_v16 = vld [vmem:[%s3760_s4 + $0x100] sm:$0xff]  }
  0x73   :  { %2706 = vmatprep.subr.bf16.mxu1 %v2944_v18  ;;  %v1682_v18 = vcombine.high %v1660_v12, %v1660_v12 }
  0x74   :  { %2685 = vmatpush3.bf16.msra.mxu0 %v2945_v19  ;;  %v2996_v19 = vld [vmem:[%s3760_s4 + $0x148] sm:$0xff]  }
  0x75   :  { %2686 = vmatprep.subr.bf16.mxu0 %v2947_v21  ;;  %v1685_v21 = vcombine.high %v1681_v15, %v1681_v15 }
  0x76   :  { %2707 = vmatpush3.bf16.msra.mxu1 %v2946_v20  ;;  %v2997_v20 = vld [vmem:[%s3760_s4 + $0x1c8] sm:$0xff]  }
  0x77   :  { %2708 = vmatprep.subr.bf16.mxu1 %v2948_v22  ;;  %v2998_v22 = vld [vmem:[%s3760_s4 + $0x108] sm:$0xff]  }
  0x78   :  { %2687 = vmatpush3.bf16.msra.mxu0 %v2949_v23  ;;  %v2999_v23 = vld [vmem:[%s3760_s4 + $0x188] sm:$0xff]  }
  0x79   :  { %2688 = vmatprep.subr.bf16.mxu0 %v2951_v25  ;;  %v3001_v25 = vld [vmem:[%s3760_s4 + $0x1d0] sm:$0xff]  }
  0x7a   :  { %2709 = vmatpush3.bf16.msra.mxu1 %v2950_v24  ;;  %v3000_v24 = vld [vmem:[%s3760_s4 + $0x150] sm:$0xff]  }
  0x7b   :  { %2710 = vmatprep.subr.bf16.mxu1 %v2952_v26  ;;  %v3002_v26 = vld [vmem:[%s3760_s4 + $0x110] sm:$0xff]  }
  0x7c   :  { %2689 = vmatpush3.bf16.msra.mxu0 %v2953_v27  ;;  %v3003_v27 = vld [vmem:[%s3760_s4 + $0x190] sm:$0xff]  }
  0x7d   :  { %2690 = vmatprep.subr.bf16.mxu0 %v2955_v29  ;;  %v3005_v29 = vld [vmem:[%s3760_s4 + $0x1d8] sm:$0xff]  }
  0x7e   :  { %2711 = vmatpush3.bf16.msra.mxu1 %v2954_v28  ;;  %v3004_v28 = vld [vmem:[%s3760_s4 + $0x158] sm:$0xff]  }
  0x7f   :  { %2712 = vmatprep.subr.bf16.mxu1 %v2956_v30  ;;  %v3006_v30 = vld [vmem:[%s3760_s4 + $0x118] sm:$0xff]  }
  0x80   :  { %2691 = vmatpush3.bf16.msra.mxu0 %v2957_v31  ;;  %v3007_v31 = vld [vmem:[%s3760_s4 + $0x198] sm:$0xff]  }
  0x81   :  { %2720 = vmatprep.subr.bf16.mxu0 %v2960_v34  ;;  %v3010_v34 = vld [vmem:[%s3760_s4 + $0x120] sm:$0xff]  }
  0x82   :  { %2713 = vmatpush3.bf16.msra.mxu1 %v2958_v32  ;;  %v3008_v32 = vld [vmem:[%s3760_s4 + $0x160] sm:$0xff]  }
  0x83   :  { %1453 = vmatmul.mubr.bf16.vlgmr.msra.gmra.mrb[12].mxu0 %v377_v33  ;;  %2742 = vmatprep.subr.bf16.mxu1 %v2961_v35  ;;  %v3009_v33 = vld [vmem:[%s3760_s4 + $0x1e0] sm:$0xff]  }
  0x84   :  { %2721 = vmatpush3.bf16.msra.mxu0 %v2962_v36  ;;  %2110 = vmatprep.mubr.bf16.mxu0 %v1674_v7  ;;  %v3011_v35 = vld [vmem:[%s3760_s4 + $0x1a0] sm:$0xff]   ;;  %v3012_v36 = vld [vmem:[%s3760_s4 + $0x168] sm:$0xff]  }
  0x85   :  { %1493 = vmatmul.mubr.bf16.vlgmr.msra.gmra.mrb[12].mxu1 %v393_v38  ;;  %2722 = vmatprep.subr.bf16.mxu0 %v2964_v39  ;;  %v3014_v38 = vld [vmem:[%s3760_s4 + $0x128] sm:$0xff]  }
  0x86   :  { %2743 = vmatpush3.bf16.msra.mxu1 %v2963_v37  ;;  %2150 = vmatprep.mubr.bf16.mxu1 %v1684_v11  ;;  %v3013_v37 = vld [vmem:[%s3760_s4 + $0x1e8] sm:$0xff]  }
  0x87   :  { %2744 = vmatprep.subr.bf16.mxu1 %v2965_v40  ;;  %v3015_v39 = vld [vmem:[%s3760_s4 + $0x1a8] sm:$0xff]   ;;  %v3016_v40 = vld [vmem:[%s3760_s4 + $0x170] sm:$0xff]  }
  0x88   :  { %2723 = vmatpush3.bf16.msra.mxu0 %v2966_v42  ;;  %v3017_v42 = vld [vmem:[%s3760_s4 + $0x1f0] sm:$0xff]  }
  0x89   :  { %2724 = vmatprep.subr.bf16.mxu0 %v2968_v44  ;;  %v3020_v44 = vld [vmem:[%s3760_s4 + $0x178] sm:$0xff]  }
  0x8a   :  { %2745 = vmatpush3.bf16.msra.mxu1 %v2967_v43  ;;  %v3018_v43 = vld [vmem:[%s3760_s4 + $0x130] sm:$0xff]  }
  0x8b   :  { %2746 = vmatprep.subr.bf16.mxu1 %v2969_v45 }
  0x8c   :  { %2725 = vmatpush3.bf16.msra.mxu0 %v2970_v46 }
  0x8d   :  { %2726 = vmatprep.subr.bf16.mxu0 %v2972_v48 }
  0x8e   :  { %2747 = vmatpush3.bf16.msra.mxu1 %v2971_v47 }
  0x8f   :  { %2748 = vmatprep.subr.bf16.mxu1 %v2973_v49 }
  0x90   :  { %2727 = vmatpush3.bf16.msra.mxu0 %v2974_v50 }
  0x91   :  { %2728 = vmatprep.subr.bf16.mxu0 %v2976_v52 }
  0x92   :  { %2749 = vmatpush3.bf16.msra.mxu1 %v2975_v51 }
  0x93   :  { %2750 = vmatprep.subr.bf16.mxu1 %v2977_v53 }
  0x94   :  { %2729 = vmatpush3.bf16.msra.mxu0 %v2978_v54 }
  0x95   :  { %2730 = vmatprep.subr.bf16.mxu0 %v2980_v56 }
  0x96   :  { %2751 = vmatpush3.bf16.msra.mxu1 %v2979_v55 }
  0x97   :  { %2752 = vmatprep.subr.bf16.mxu1 %v2981_v57 }
  0x98   :  { %2731 = vmatpush3.bf16.msra.mxu0 %v2982_v58 }
  0x99   :  { %2732 = vmatprep.subr.bf16.mxu0 %v2984_v60 }
  0x9a   :  { %2753 = vmatpush3.bf16.msra.mxu1 %v2983_v59 }
  0x9b   :  { %2754 = vmatprep.subr.bf16.mxu1 %v2985_v62 }
  0x9c   :  { %2733 = vmatpush3.bf16.msra.mxu0 %v2986_v1 }
  0x9d   :  { %2734 = vmatprep.subr.bf16.mxu0 %v2988_v5 }
  0x9e   :  { %2755 = vmatpush3.bf16.msra.mxu1 %v2987_v2 }
  0x9f   :  { %2756 = vmatprep.subr.bf16.mxu1 %v2989_v6 }
  0xa0   :  { %2735 = vmatpush3.bf16.msra.mxu0 %v2990_v9 }
  0xa1   :  { %2764 = vmatprep.subr.bf16.mxu0 %v2992_v13 }
  0xa2   :  { %2757 = vmatpush3.bf16.msra.mxu1 %v2991_v10 }
  0xa3   :  { %2111 = vmatmul.mubr.bf16.vlgmr.msra.gmra.mrb[16].mxu0 %v1660_v12  ;;  %2786 = vmatprep.subr.bf16.mxu1 %v2993_v14 }
  0xa4   :  { %2765 = vmatpush3.bf16.msra.mxu0 %v2994_v16  ;;  %2190 = vmatprep.mubr.bf16.mxu0 %v1681_v15 }
  0xa5   :  { %2151 = vmatmul.mubr.bf16.vlgmr.msra.gmra.mrb[16].mxu1 %v1682_v18  ;;  %2766 = vmatprep.subr.bf16.mxu0 %v2996_v19 }
  0xa6   :  { %2787 = vmatpush3.bf16.msra.mxu1 %v2995_v17  ;;  %2230 = vmatprep.mubr.bf16.mxu1 %v1685_v21 }
  0xa7   :  { %2788 = vmatprep.subr.bf16.mxu1 %v2997_v20 }
  0xa8   :  { %2767 = vmatpush3.bf16.msra.mxu0 %v2998_v22 }
  0xa9   :  { %2768 = vmatprep.subr.bf16.mxu0 %v3000_v24 }
  0xaa   :  { %2789 = vmatpush3.bf16.msra.mxu1 %v2999_v23 }
  0xab   :  { %2790 = vmatprep.subr.bf16.mxu1 %v3001_v25 }
  0xac   :  { %2769 = vmatpush3.bf16.msra.mxu0 %v3002_v26 }
  0xad   :  { %2770 = vmatprep.subr.bf16.mxu0 %v3004_v28 }
  0xae   :  { %2791 = vmatpush3.bf16.msra.mxu1 %v3003_v27 }
  0xaf   :  { %2792 = vmatprep.subr.bf16.mxu1 %v3005_v29 }
  0xb0   :  { %2771 = vmatpush3.bf16.msra.mxu0 %v3006_v30 }
  0xb1   :  { %2772 = vmatprep.subr.bf16.mxu0 %v3008_v32 }
  0xb2   :  { %2793 = vmatpush3.bf16.msra.mxu1 %v3007_v31 }
  0xb3   :  { %2794 = vmatprep.subr.bf16.mxu1 %v3009_v33 }
  0xb4   :  { %2773 = vmatpush3.bf16.msra.mxu0 %v3010_v34 }
  0xb5   :  { %2774 = vmatprep.subr.bf16.mxu0 %v3012_v36 }
  0xb6   :  { %2795 = vmatpush3.bf16.msra.mxu1 %v3011_v35 }
  0xb7   :  { %2796 = vmatprep.subr.bf16.mxu1 %v3013_v37 }
  0xb8   :  { %2775 = vmatpush3.bf16.msra.mxu0 %v3014_v38 }
  0xb9   :  { %2776 = vmatprep.subr.bf16.mxu0 %v3016_v40 }
  0xba   :  { %13 = vsyncpa [#allocation3], 0  ;;  %2797 = vmatpush3.bf16.msra.mxu1 %v3015_v39  ;;  %v3019_v45 = vld [vmem:[%s3760_s4 + $0x1b0] sm:$0xff]   ;;  %v3021_v46 = vld [vmem:[%s3760_s4 + $0x1f8] sm:$0xff]   ;;  %v1667_v48 = vrot.slane %v3606_v4, %v3208_v41  ;;  %v3054_v12 = vmov 0.0   ;;  %vm3055_vm0 = vmmov 0  }
  0xbb   :  { %2798 = vmatprep.subr.bf16.mxu1 %v3017_v42  ;;  %v3022_v47 = vld [vmem:[%s3760_s4 + $0x138] sm:$0xff]   ;;  %v2344_v52 = vld [vmem:[%s3758_s2] ss:$0 sm:$0xff]  ;;  %v3026_v13 = vld [vmem:[%s3762_s6 + $0x8] sm:$0xff]   ;;  %vm2242_vm1 = vcmask 261120   ;;  %vm2285_vm2 = vcmask 523264  }
  0xbc   :  { %2777 = vmatpush3.bf16.msra.mxu0 %v3018_v43  ;;  %v3023_v49 = vld [vmem:[%s3760_s4 + $0x1b8] sm:$0xff]   ;;  %v1683_v50 = vcombine.high %v1667_v48, %v1667_v48  ;;  %v3025_v11 = vld [vmem:[%s3762_s6] sm:$0xff]   ;;  %v3027_v14 = vld [vmem:[%s3762_s6 + $0x10] sm:$0xff]   ;;  %s3057_s13 = smov [#allocation2]  }
  0xbd   :  { %2778 = vmatprep.subr.bf16.mxu0 %v3020_v44  ;;  %v2473_v40 = vld [vmem:[%s3761_s5] ss:$0 sm:$0xff]  ;;  %s3056_s5 = smov 32   ;;  %s2336_s14 = sshll.u32 %s3057_s13, 4  ;;  %s2337_s14 = int_to_ptr.vmem [resolvable:$true] %s2336_s14 }
  0xbe   :  { %2799 = vmatpush3.bf16.msra.mxu1 %v3019_v45  ;;  %s3029_s15 = scalar_lea.vmem %s2337_s14, 32  ;;  %p3034_p1 = scmp.lt.s32.totalorder %s2337_s14, %s2337_s14 }
  0xbf   :  { %2800 = vmatprep.subr.bf16.mxu1 %v3021_v46  ;;  %p3030_p0 = scmp.ne.s32.totalorder %s2337_s14, %s3029_s15  ;;  %p3035_p2 = scmp.lt.s32.totalorder %s3029_s15, %s3029_s15 }
  0xc0   :  { %2779 = vmatpush3.bf16.msra.mxu0 %v3022_v47 }
  0xc1   :  { %2813 = vmatprep.subr.bf16.mxu0 %v3054_v12  ;;  %p3036_p3 = por %p3035_p2, %p3034_p1 }
  0xc2   :  { %2801 = vmatpush3.bf16.msra.mxu1 %v3023_v49 }
  0xc3   :  { %2191 = vmatmul.mubr.bf16.vlgmr.msra.gmra.mrb[20].mxu0 %v1667_v48  ;;  %p3037_p4 = pnand %p3036_p3, %p3030_p0 }
  0xc4   :  { %2814 = vmatpush3.bf16.msra.mxu0 %v3025_v11  ;;  %2821 = vmatprep.mubr.msk.bf16.mxu0 %vm3055_vm0, %v3054_v12 }
  0xc5   :  { %2231 = vmatmul.mubr.bf16.vlgmr.msra.gmra.mrb[20].mxu1 %v1683_v50  ;;  %2815 = vmatprep.subr.bf16.mxu0 %v3054_v12 }
  0xc8   :  { %2816 = vmatpush3.bf16.msra.mxu0 %v3026_v13 }
  0xc9   :  { %2817 = vmatprep.subr.bf16.mxu0 %v3054_v12 }
  0xcc   :  { %2818 = vmatpush3.bf16.msra.mxu0 %v3027_v14 }
  0xcd   :  { %2819 = vmatprep.subr.bf16.mxu0 %v3054_v12 }
  0xf6   :  { %v2560_v51 = vpop.f32.mrb[0].mxu0 }
  0xf7   :  { %v2561_v53 = vpop.f32.mrb[1].mxu0  ;;  %v2582_v54 = vpop.f32.mrb[0].mxu1 }
  0xf8   :  { %v2562_v55 = vadd.f32 %v2561_v53, %v2560_v51  ;;  %v2563_v41 = vpop.f32.mrb[2].mxu0  ;;  %v2583_v56 = vpop.f32.mrb[1].mxu1  ;;  %v3028_v53 = vld [vmem:[%s3762_s6 + $0x18] sm:$0xff]  }
  0xf9   :  { %v2564_v57 = vpop.f32.mrb[3].mxu0  ;;  %v2584_v59 = vadd.f32 %v2583_v56, %v2582_v54  ;;  %v2585_v60 = vpop.f32.mrb[2].mxu1  ;;  %2820 = vmatpush3.bf16.msra.mxu0 %v3028_v53 }
  0xfa   :  { %v1215_v58 = vadd.f32 %v2562_v55, %v2344_v52  ;;  %v2586_v61 = vpop.f32.mrb[3].mxu1 }
  0xfc   :  { %v1255_v62 = vadd.f32 %v2584_v59, %v1215_v58 }
 0x116   :  { %v2604_v63 = vpop.f32.mrb[4].mxu0 }
 0x117   :  { %v2605_v0 = vpop.f32.mrb[5].mxu0  ;;  %v2626_v1 = vpop.f32.mrb[4].mxu1 }
 0x118   :  { %v2606_v2 = vadd.f32 %v2605_v0, %v2604_v63  ;;  %v2607_v3 = vpop.f32.mrb[6].mxu0  ;;  %v2627_v4 = vpop.f32.mrb[5].mxu1 }
 0x119   :  { %v2608_v5 = vpop.f32.mrb[7].mxu0  ;;  %v2628_v7 = vadd.f32 %v2627_v4, %v2626_v1  ;;  %v2629_v8 = vpop.f32.mrb[6].mxu1 }
 0x11a   :  { %v1295_v6 = vadd.f32 %v2606_v2, %v1255_v62  ;;  %v2630_v9 = vpop.f32.mrb[7].mxu1  ;;  %v2538_v5 = vld [vmem:[%s3763_s7] ss:$0 sm:$0xff] }
 0x11c   :  { %v1335_v10 = vadd.f32 %v2628_v7, %v1295_v6 }
 0x136   :  { %v2648_v15 = vpop.f32.mrb[8].mxu0 }
 0x137   :  { %v2649_v16 = vpop.f32.mrb[9].mxu0 }
 0x138   :  { %v2670_v17 = vpop.f32.mrb[8].mxu1  ;;  %v2650_v18 = vadd.f32 %v2649_v16, %v2648_v15  ;;  %v2651_v19 = vpop.f32.mrb[10].mxu0 }
 0x139   :  { %v2671_v20 = vpop.f32.mrb[9].mxu1  ;;  %v2652_v21 = vpop.f32.mrb[11].mxu0 }
 0x13a   :  { %v1375_v22 = vadd.f32 %v2650_v18, %v1335_v10  ;;  %v2672_v23 = vadd.f32 %v2671_v20, %v2670_v17  ;;  %v2673_v24 = vpop.f32.mrb[10].mxu1 }
 0x13b   :  { %v2674_v25 = vpop.f32.mrb[11].mxu1 }
 0x13c   :  { %v1415_v26 = vadd.f32 %v2672_v23, %v1375_v22 }
 0x156   :  { %v2692_v27 = vpop.f32.mrb[12].mxu0 }
 0x157   :  { %v2693_v28 = vpop.f32.mrb[13].mxu0 }
 0x158   :  { %v2714_v29 = vpop.f32.mrb[12].mxu1  ;;  %v2694_v30 = vadd.f32 %v2693_v28, %v2692_v27  ;;  %v2695_v31 = vpop.f32.mrb[14].mxu0 }
 0x159   :  { %v2715_v32 = vpop.f32.mrb[13].mxu1  ;;  %v2696_v33 = vpop.f32.mrb[15].mxu0 }
 0x15a   :  { %v1455_v34 = vadd.f32 %v2694_v30, %v1415_v26  ;;  %v2716_v35 = vadd.f32 %v2715_v32, %v2714_v29  ;;  %v2717_v36 = vpop.f32.mrb[14].mxu1 }
 0x15b   :  { %v2718_v37 = vpop.f32.mrb[15].mxu1 }
 0x15c   :  { %v1495_v38 = vadd.f32 %v2716_v35, %v1455_v34 }
 0x176   :  { %v2736_v39 = vpop.f32.mrb[16].mxu0 }
 0x177   :  { %v2737_v42 = vpop.f32.mrb[17].mxu0 }
 0x178   :  { %v2758_v43 = vpop.f32.mrb[16].mxu1  ;;  %v2738_v44 = vadd.f32 %v2737_v42, %v2736_v39  ;;  %v2739_v45 = vpop.f32.mrb[18].mxu0 }
 0x179   :  { %v2759_v46 = vpop.f32.mrb[17].mxu1  ;;  %v2740_v47 = vpop.f32.mrb[19].mxu0 }
 0x17a   :  { %v2113_v48 = vadd.f32 %v2738_v44, %v2473_v40  ;;  %v2760_v49 = vadd.f32 %v2759_v46, %v2758_v43  ;;  %v2761_v50 = vpop.f32.mrb[18].mxu1 }
 0x17b   :  { %v2762_v51 = vpop.f32.mrb[19].mxu1 }
 0x17c   :  { %v2153_v52 = vadd.f32 %v2760_v49, %v2113_v48 }
 0x196   :  { %v2780_v54 = vpop.f32.mrb[20].mxu0 }
 0x197   :  { %v2781_v55 = vpop.f32.mrb[21].mxu0 }
 0x198   :  { %v2802_v41 = vpop.f32.mrb[20].mxu1  ;;  %v2782_v56 = vadd.f32 %v2781_v55, %v2780_v54  ;;  %v2783_v57 = vpop.f32.mrb[22].mxu0 }
 0x199   :  { %v2803_v58 = vpop.f32.mrb[21].mxu1  ;;  %v2784_v59 = vpop.f32.mrb[23].mxu0 }
 0x19a   :  { %v2193_v60 = vadd.f32 %v2782_v56, %v2153_v52  ;;  %v2804_v61 = vadd.f32 %v2803_v58, %v2802_v41  ;;  %v2805_v62 = vpop.f32.mrb[22].mxu1 }
 0x19b   :  { %v2806_v63 = vpop.f32.mrb[23].mxu1 }
 0x19c   :  { %v2233_v0 = vadd.f32 %v2804_v61, %v2193_v60 }
 0x19e   :  { %2239 = vrot.lane.b32.xlu0 %v2233_v0, %s3056_s5 }
 0x210   :  { %v2240_v1 = vpop.permute.xlu0 %2239 }
 0x211   :  { %v2243_v2 = vsel %vm2242_vm1, %v1495_v38, %v2240_v1 }
 0x212   :  { %v2244_v3 = vmax.f32 %v2243_v2, 0.0 }
 0x214   :  { %v2245_v4 = vpack.c.bf16 %v2244_v3, %v2244_v3 }
 0x216   :  { %2822 = vmatmul.mubr.msk.bf16.vlgmr.msra.gmra.mrb[24].mxu0 %vm2285_vm2, %v2245_v4 }
 0x2e9   :  { %v2323_v6 = vpop.f32.mrb[24].mxu0 }
 0x2ea   :  { %v2324_v7 = vadd.f32 %v2538_v5, %v2323_v6  ;;  %v2823_v8 = vpop.f32.mrb[25].mxu0 }
 0x2eb   :  { %v2326_v9 = vpop.f32.mrb[26].mxu0 }
 0x2ec   :  { %2329 = vst [vmem:[#allocation2] sm:$0x3] %v2324_v7  ;;  %v2824_v10 = vpop.f32.mrb[27].mxu0 }
 0x2ed   :  { %3040 = shalt.err (!%p3037_p4)
}
 0x2ee   :  { %s3041_s7 = scalar_lea.hbm %s3764_s8, 32 }
 0x2ef   :  { %p3042_p5 = scmp.ne.s32.totalorder %s3764_s8, %s3041_s7  ;;  %p3045_p6 = scmp.lt.u32.totalorder %s3041_s7, %s3764_s8 }
 0x2f1   :  { %p3047_p7 = pnand %p3045_p6, %p3042_p5 }
 0x2f3   :  { %3050 = shalt.err (!%p3047_p7)
}
 0x2f4   :  { %2339 = dma.vmem_to_hbm [thread:$0]  %s2337_s14, 32, %s3764_s8, [#allocation3]  }
 0x2f5   :  { %3051 = dma.done.wait [#allocation3], 32  }
 0x2f6   :  { %3052 = vsyncadd [#allocation3], 4294967264 }
 0x2f7   :  { %2343 = vsyncpa [#allocation3], 1 }

</bundles_post_ra>
